<compile_context>
chip_gen: v7x
topology: tpu7x:2x2x1
jax: 0.10.0
libtpu: 0.0.40
codegen_flags: <defaults>
</compile_context>

<pallas_src>
import jax
import jax.numpy as jnp
from jax.experimental import pallas as pl
from jax.experimental.pallas import tpu as pltpu


def lstm_tagger_kernel(sent_ref,   # SMEM (seq,)        int32 token ids
                       emb_ref,    # VMEM (vocab, 1, E) embedding table
                       wih_ref,    # VMEM (E, 4H)       W_ih^T, gate order [i,f,g,o]
                       whh_ref,    # VMEM (H, 4H)       W_hh^T, gate order [i,f,g,o]
                       b_ref,      # VMEM (1, 4H)       b_ih + b_hh
                       wt_ref,     # VMEM (H, T)        W_tag^T
                       bt_ref,     # VMEM (1, T)        b_tag
                       out_ref):   # VMEM (seq, T)      log-softmax tag scores
    seq = out_ref.shape[0]
    four_h = whh_ref.shape[1]
    H = four_h // 4

    # ---- Phase 1: gather all embeddings, hoist input-to-hidden matmul ----
    xs = []
    for t in range(seq):                          # static unroll; t is static
        tok = sent_ref[t]                         # int32 scalar from SMEM
        xs.append(emb_ref[tok])                   # (1, E) dynamic leading-dim gather
    xs_mat = jnp.concatenate(xs, axis=0)          # (seq, E)

    # x_t @ W_ih^T + (b_ih + b_hh) for every timestep in one MXU call.
    x_gates = (jnp.dot(xs_mat, wih_ref[...], preferred_element_type=jnp.float32)
               + b_ref[...])                      # (seq, 4H)

    whh = whh_ref[...]                            # (H, 4H), loaded once

    # ---- Phase 2: serial recurrence (only h @ W_hh^T remains per step) ----
    h = jnp.zeros((1, H), jnp.float32)
    c = jnp.zeros((1, H), jnp.float32)
    hs = []
    for t in range(seq):                          # static unroll (seq small/static)
        gates = (x_gates[t:t + 1, :]
                 + jnp.dot(h, whh, preferred_element_type=jnp.float32))  # (1, 4H)

        i_g = jax.nn.sigmoid(gates[:, 0 * H:1 * H])
        f_g = jax.nn.sigmoid(gates[:, 1 * H:2 * H])
        g_g = jnp.tanh(gates[:, 2 * H:3 * H])
        o_g = jax.nn.sigmoid(gates[:, 3 * H:4 * H])

        c = f_g * c + i_g * g_g
        h = o_g * jnp.tanh(c)
        hs.append(h)

    hs_mat = jnp.concatenate(hs, axis=0)          # (seq, H)

    # ---- Phase 3: hidden2tag for all timesteps + stable log_softmax(dim=1) ----
    tag = (jnp.dot(hs_mat, wt_ref[...], preferred_element_type=jnp.float32)
           + bt_ref[...])                         # (seq, T)
    m = jnp.max(tag, axis=-1, keepdims=True)
    z = tag - m
    lse = jnp.log(jnp.sum(jnp.exp(z), axis=-1, keepdims=True))
    out_ref[...] = z - lse                        # single store of the whole output


@jax.jit
def lstm_tagger_forward(sentence, emb_table, w_ih, w_hh, b_ih, b_hh, w_tag, b_tag):
    seq = sentence.shape[0]
    vocab, E = emb_table.shape
    H = w_hh.shape[1]
    T = w_tag.shape[0]

    # Parameter re-layouts (fused/hoisted by jit; outside the pallas_call path).
    wih_t = jnp.transpose(w_ih)                          # (E, 4H)
    whh_t = jnp.transpose(w_hh)                          # (H, 4H)
    b = (b_ih + b_hh).reshape(1, 4 * H)
    wt = jnp.transpose(w_tag)                            # (H, T)
    bt = b_tag.reshape(1, T)
    emb3 = emb_table.reshape(vocab, 1, E)                # leading-dim indexable table

    return pl.pallas_call(
        lstm_tagger_kernel,
        out_shape=jax.ShapeDtypeStruct((seq, T), jnp.float32),
        in_specs=[
            pl.BlockSpec(memory_space=pltpu.MemorySpace.SMEM),   # sentence ids
            pl.BlockSpec(memory_space=pltpu.MemorySpace.VMEM),   # embedding table
            pl.BlockSpec(memory_space=pltpu.MemorySpace.VMEM),   # W_ih^T
            pl.BlockSpec(memory_space=pltpu.MemorySpace.VMEM),   # W_hh^T
            pl.BlockSpec(memory_space=pltpu.MemorySpace.VMEM),   # fused gate bias
            pl.BlockSpec(memory_space=pltpu.MemorySpace.VMEM),   # tag weights
            pl.BlockSpec(memory_space=pltpu.MemorySpace.VMEM),   # tag bias
        ],
        out_specs=pl.BlockSpec(memory_space=pltpu.MemorySpace.VMEM),
    )(sentence.astype(jnp.int32), emb3, wih_t, whh_t, b, wt, bt)


def ref_forward(sentence, emb_table, w_ih, w_hh, b_ih, b_hh, w_tag, b_tag):
    """Pure-JAX reference mirroring PyTorch LSTM semantics (batch=1)."""
    embeds = emb_table[sentence]                 # (seq, E)
    H = w_hh.shape[1]

    def step(carry, x):
        h, c = carry
        gates = x @ w_ih.T + b_ih + h @ w_hh.T + b_hh
        i = jax.nn.sigmoid(gates[0 * H:1 * H])
        f = jax.nn.sigmoid(gates[1 * H:2 * H])
        g = jnp.tanh(gates[2 * H:3 * H])
        o = jax.nn.sigmoid(gates[3 * H:4 * H])
        c = f * c + i * g
        h = o * jnp.tanh(c)
        return (h, c), h

    init = (jnp.zeros((H,), jnp.float32), jnp.zeros((H,), jnp.float32))
    _, hs = jax.lax.scan(step, init, embeds)     # (seq, H)
    tag = hs @ w_tag.T + b_tag                   # (seq, T)
    return jax.nn.log_softmax(tag, axis=1)


if __name__ == "__main__":
    # small shapes consistent with the module's forward
    EMBEDDING_DIM = 32
    HIDDEN_DIM = 32
    VOCAB_SIZE = 16
    TAGSET_SIZE = 8
    SEQ_LEN = 8

    key = jax.random.PRNGKey(0)
    ks = jax.random.split(key, 8)

    sentence = jax.random.randint(ks[0], (SEQ_LEN,), 0, VOCAB_SIZE, dtype=jnp.int32)
    emb_table = jax.random.normal(ks[1], (VOCAB_SIZE, EMBEDDING_DIM), jnp.float32) * 0.5
    scale = 1.0 / jnp.sqrt(HIDDEN_DIM).astype(jnp.float32)
    w_ih = jax.random.uniform(ks[2], (4 * HIDDEN_DIM, EMBEDDING_DIM), jnp.float32,
                              -scale, scale)
    w_hh = jax.random.uniform(ks[3], (4 * HIDDEN_DIM, HIDDEN_DIM), jnp.float32,
                              -scale, scale)
    b_ih = jax.random.uniform(ks[4], (4 * HIDDEN_DIM,), jnp.float32, -scale, scale)
    b_hh = jax.random.uniform(ks[5], (4 * HIDDEN_DIM,), jnp.float32, -scale, scale)
    w_tag = jax.random.uniform(ks[6], (TAGSET_SIZE, HIDDEN_DIM), jnp.float32,
                               -scale, scale)
    b_tag = jax.random.uniform(ks[7], (TAGSET_SIZE,), jnp.float32, -scale, scale)

    out = lstm_tagger_forward(sentence, emb_table, w_ih, w_hh, b_ih, b_hh,
                              w_tag, b_tag)
    out = jax.block_until_ready(out)

    ref = ref_forward(sentence, emb_table, w_ih, w_hh, b_ih, b_hh, w_tag, b_tag)
    ref = jax.block_until_ready(ref)

    assert out.shape == (SEQ_LEN, TAGSET_SIZE)
    assert jnp.allclose(out, ref, atol=1e-2, rtol=1e-2), \
        f"max abs err = {jnp.max(jnp.abs(out - ref))}"

    print("KERNEL_OK")
</pallas_src>

<mosaic_0001>
module attributes {stable_mosaic.version = 11 : i64} {
  func.func @lstm_tagger_kernel(%arg0: memref<8xi32, #tpu.memory_space<smem>>, %arg1: memref<16x1x32xf32, #tpu.memory_space<vmem>>, %arg2: memref<32x128xf32, #tpu.memory_space<vmem>>, %arg3: memref<32x128xf32, #tpu.memory_space<vmem>>, %arg4: memref<1x128xf32, #tpu.memory_space<vmem>>, %arg5: memref<32x8xf32, #tpu.memory_space<vmem>>, %arg6: memref<1x8xf32, #tpu.memory_space<vmem>>, %arg7: memref<8x8xf32, #tpu.memory_space<vmem>>) attributes {dimension_semantics = [], scalar_prefetch = 0 : i64, scratch_operands = 0 : i64, tpu.core_type = #tpu.core_type<tc>} {
    %c0 = arith.constant 0 : index
    %0 = memref.load %arg0[%c0] : memref<8xi32, #tpu.memory_space<smem>>
    %1 = arith.index_cast %0 : i32 to index
    %c0_0 = arith.constant 0 : index
    %c0_1 = arith.constant 0 : index
    %2 = vector.load %arg1[%1, %c0_0, %c0_1] : memref<16x1x32xf32, #tpu.memory_space<vmem>>, vector<1x1x32xf32>
    %3 = vector.shape_cast %2 : vector<1x1x32xf32> to vector<1x32xf32>
    %c1 = arith.constant 1 : index
    %4 = memref.load %arg0[%c1] : memref<8xi32, #tpu.memory_space<smem>>
    %5 = arith.index_cast %4 : i32 to index
    %c0_2 = arith.constant 0 : index
    %c0_3 = arith.constant 0 : index
    %6 = vector.load %arg1[%5, %c0_2, %c0_3] : memref<16x1x32xf32, #tpu.memory_space<vmem>>, vector<1x1x32xf32>
    %7 = vector.shape_cast %6 : vector<1x1x32xf32> to vector<1x32xf32>
    %c2 = arith.constant 2 : index
    %8 = memref.load %arg0[%c2] : memref<8xi32, #tpu.memory_space<smem>>
    %9 = arith.index_cast %8 : i32 to index
    %c0_4 = arith.constant 0 : index
    %c0_5 = arith.constant 0 : index
    %10 = vector.load %arg1[%9, %c0_4, %c0_5] : memref<16x1x32xf32, #tpu.memory_space<vmem>>, vector<1x1x32xf32>
    %11 = vector.shape_cast %10 : vector<1x1x32xf32> to vector<1x32xf32>
    %c3 = arith.constant 3 : index
    %12 = memref.load %arg0[%c3] : memref<8xi32, #tpu.memory_space<smem>>
    %13 = arith.index_cast %12 : i32 to index
    %c0_6 = arith.constant 0 : index
    %c0_7 = arith.constant 0 : index
    %14 = vector.load %arg1[%13, %c0_6, %c0_7] : memref<16x1x32xf32, #tpu.memory_space<vmem>>, vector<1x1x32xf32>
    %15 = vector.shape_cast %14 : vector<1x1x32xf32> to vector<1x32xf32>
    %c4 = arith.constant 4 : index
    %16 = memref.load %arg0[%c4] : memref<8xi32, #tpu.memory_space<smem>>
    %17 = arith.index_cast %16 : i32 to index
    %c0_8 = arith.constant 0 : index
    %c0_9 = arith.constant 0 : index
    %18 = vector.load %arg1[%17, %c0_8, %c0_9] : memref<16x1x32xf32, #tpu.memory_space<vmem>>, vector<1x1x32xf32>
    %19 = vector.shape_cast %18 : vector<1x1x32xf32> to vector<1x32xf32>
    %c5 = arith.constant 5 : index
    %20 = memref.load %arg0[%c5] : memref<8xi32, #tpu.memory_space<smem>>
    %21 = arith.index_cast %20 : i32 to index
    %c0_10 = arith.constant 0 : index
    %c0_11 = arith.constant 0 : index
    %22 = vector.load %arg1[%21, %c0_10, %c0_11] : memref<16x1x32xf32, #tpu.memory_space<vmem>>, vector<1x1x32xf32>
    %23 = vector.shape_cast %22 : vector<1x1x32xf32> to vector<1x32xf32>
    %c6 = arith.constant 6 : index
    %24 = memref.load %arg0[%c6] : memref<8xi32, #tpu.memory_space<smem>>
    %25 = arith.index_cast %24 : i32 to index
    %c0_12 = arith.constant 0 : index
    %c0_13 = arith.constant 0 : index
    %26 = vector.load %arg1[%25, %c0_12, %c0_13] : memref<16x1x32xf32, #tpu.memory_space<vmem>>, vector<1x1x32xf32>
    %27 = vector.shape_cast %26 : vector<1x1x32xf32> to vector<1x32xf32>
    %c7 = arith.constant 7 : index
    %28 = memref.load %arg0[%c7] : memref<8xi32, #tpu.memory_space<smem>>
    %29 = arith.index_cast %28 : i32 to index
    %c0_14 = arith.constant 0 : index
    %c0_15 = arith.constant 0 : index
    %30 = vector.load %arg1[%29, %c0_14, %c0_15] : memref<16x1x32xf32, #tpu.memory_space<vmem>>, vector<1x1x32xf32>
    %31 = vector.shape_cast %30 : vector<1x1x32xf32> to vector<1x32xf32>
    %32 = tpu.concatenate %3, %7, %11, %15, %19, %23, %27, %31 in 0 : vector<1x32xf32>, vector<1x32xf32>, vector<1x32xf32>, vector<1x32xf32>, vector<1x32xf32>, vector<1x32xf32>, vector<1x32xf32>, vector<1x32xf32> -> vector<8x32xf32>
    %c0_16 = arith.constant 0 : index
    %c0_17 = arith.constant 0 : index
    %33 = vector.load %arg2[%c0_16, %c0_17] : memref<32x128xf32, #tpu.memory_space<vmem>>, vector<32x128xf32>
    %cst = arith.constant dense<0.000000e+00> : vector<8x128xf32>
    %34 = tpu.matmul %32, %33, %cst {dimension_numbers = #tpu.dot_dimension_numbers<[1], [0], [0], [1], [0, 0, 1, 1], [], []>} : vector<8x32xf32>, vector<32x128xf32>, vector<8x128xf32> -> vector<8x128xf32>
    %c0_18 = arith.constant 0 : index
    %c0_19 = arith.constant 0 : index
    %35 = vector.load %arg4[%c0_18, %c0_19] : memref<1x128xf32, #tpu.memory_space<vmem>>, vector<1x128xf32>
    %36 = vector.broadcast %35 : vector<1x128xf32> to vector<8x128xf32>
    %37 = arith.addf %34, %36 : vector<8x128xf32>
    %c0_20 = arith.constant 0 : index
    %c0_21 = arith.constant 0 : index
    %38 = vector.load %arg3[%c0_20, %c0_21] : memref<32x128xf32, #tpu.memory_space<vmem>>, vector<32x128xf32>
    %cst_22 = arith.constant 0.000000e+00 : f32
    %39 = vector.broadcast %cst_22 : f32 to vector<1x32xf32>
    %cst_23 = arith.constant 0.000000e+00 : f32
    %40 = vector.broadcast %cst_23 : f32 to vector<1x32xf32>
    %41 = vector.extract_strided_slice %37 {offsets = [0, 0], sizes = [1, 128], strides = [1, 1]} : vector<8x128xf32> to vector<1x128xf32>
    %cst_24 = arith.constant dense<0.000000e+00> : vector<1x128xf32>
    %42 = tpu.matmul %39, %38, %cst_24 {dimension_numbers = #tpu.dot_dimension_numbers<[1], [0], [0], [1], [0, 0, 1, 1], [], []>} : vector<1x32xf32>, vector<32x128xf32>, vector<1x128xf32> -> vector<1x128xf32>
    %43 = arith.addf %41, %42 : vector<1x128xf32>
    %44 = vector.extract_strided_slice %43 {offsets = [0, 0], sizes = [1, 32], strides = [1, 1]} : vector<1x128xf32> to vector<1x32xf32>
    %45 = arith.negf %44 : vector<1x32xf32>
    %46 = math.exp %45 : vector<1x32xf32>
    %cst_25 = arith.constant 1.000000e+00 : f32
    %47 = vector.broadcast %cst_25 : f32 to vector<1x32xf32>
    %48 = arith.addf %47, %46 : vector<1x32xf32>
    %49 = arith.divf %47, %48 : vector<1x32xf32>
    %50 = vector.extract_strided_slice %43 {offsets = [0, 32], sizes = [1, 32], strides = [1, 1]} : vector<1x128xf32> to vector<1x32xf32>
    %51 = arith.negf %50 : vector<1x32xf32>
    %52 = math.exp %51 : vector<1x32xf32>
    %cst_26 = arith.constant 1.000000e+00 : f32
    %53 = vector.broadcast %cst_26 : f32 to vector<1x32xf32>
    %54 = arith.addf %53, %52 : vector<1x32xf32>
    %55 = arith.divf %53, %54 : vector<1x32xf32>
    %56 = vector.extract_strided_slice %43 {offsets = [0, 64], sizes = [1, 32], strides = [1, 1]} : vector<1x128xf32> to vector<1x32xf32>
    %57 = math.tanh %56 : vector<1x32xf32>
    %58 = vector.extract_strided_slice %43 {offsets = [0, 96], sizes = [1, 32], strides = [1, 1]} : vector<1x128xf32> to vector<1x32xf32>
    %59 = arith.negf %58 : vector<1x32xf32>
    %60 = math.exp %59 : vector<1x32xf32>
    %cst_27 = arith.constant 1.000000e+00 : f32
    %61 = vector.broadcast %cst_27 : f32 to vector<1x32xf32>
    %62 = arith.addf %61, %60 : vector<1x32xf32>
    %63 = arith.divf %61, %62 : vector<1x32xf32>
    %64 = arith.mulf %55, %40 : vector<1x32xf32>
    %65 = arith.mulf %49, %57 : vector<1x32xf32>
    %66 = arith.addf %64, %65 : vector<1x32xf32>
    %67 = math.tanh %66 : vector<1x32xf32>
    %68 = arith.mulf %63, %67 : vector<1x32xf32>
    %69 = vector.extract_strided_slice %37 {offsets = [1, 0], sizes = [1, 128], strides = [1, 1]} : vector<8x128xf32> to vector<1x128xf32>
    %cst_28 = arith.constant dense<0.000000e+00> : vector<1x128xf32>
    %70 = tpu.matmul %68, %38, %cst_28 {dimension_numbers = #tpu.dot_dimension_numbers<[1], [0], [0], [1], [0, 0, 1, 1], [], []>} : vector<1x32xf32>, vector<32x128xf32>, vector<1x128xf32> -> vector<1x128xf32>
    %71 = arith.addf %69, %70 : vector<1x128xf32>
    %72 = vector.extract_strided_slice %71 {offsets = [0, 0], sizes = [1, 32], strides = [1, 1]} : vector<1x128xf32> to vector<1x32xf32>
    %73 = arith.negf %72 : vector<1x32xf32>
    %74 = math.exp %73 : vector<1x32xf32>
    %cst_29 = arith.constant 1.000000e+00 : f32
    %75 = vector.broadcast %cst_29 : f32 to vector<1x32xf32>
    %76 = arith.addf %75, %74 : vector<1x32xf32>
    %77 = arith.divf %75, %76 : vector<1x32xf32>
    %78 = vector.extract_strided_slice %71 {offsets = [0, 32], sizes = [1, 32], strides = [1, 1]} : vector<1x128xf32> to vector<1x32xf32>
    %79 = arith.negf %78 : vector<1x32xf32>
    %80 = math.exp %79 : vector<1x32xf32>
    %cst_30 = arith.constant 1.000000e+00 : f32
    %81 = vector.broadcast %cst_30 : f32 to vector<1x32xf32>
    %82 = arith.addf %81, %80 : vector<1x32xf32>
    %83 = arith.divf %81, %82 : vector<1x32xf32>
    %84 = vector.extract_strided_slice %71 {offsets = [0, 64], sizes = [1, 32], strides = [1, 1]} : vector<1x128xf32> to vector<1x32xf32>
    %85 = math.tanh %84 : vector<1x32xf32>
    %86 = vector.extract_strided_slice %71 {offsets = [0, 96], sizes = [1, 32], strides = [1, 1]} : vector<1x128xf32> to vector<1x32xf32>
    %87 = arith.negf %86 : vector<1x32xf32>
    %88 = math.exp %87 : vector<1x32xf32>
    %cst_31 = arith.constant 1.000000e+00 : f32
    %89 = vector.broadcast %cst_31 : f32 to vector<1x32xf32>
    %90 = arith.addf %89, %88 : vector<1x32xf32>
    %91 = arith.divf %89, %90 : vector<1x32xf32>
    %92 = arith.mulf %83, %66 : vector<1x32xf32>
    %93 = arith.mulf %77, %85 : vector<1x32xf32>
    %94 = arith.addf %92, %93 : vector<1x32xf32>
    %95 = math.tanh %94 : vector<1x32xf32>
    %96 = arith.mulf %91, %95 : vector<1x32xf32>
    %97 = vector.extract_strided_slice %37 {offsets = [2, 0], sizes = [1, 128], strides = [1, 1]} : vector<8x128xf32> to vector<1x128xf32>
    %cst_32 = arith.constant dense<0.000000e+00> : vector<1x128xf32>
    %98 = tpu.matmul %96, %38, %cst_32 {dimension_numbers = #tpu.dot_dimension_numbers<[1], [0], [0], [1], [0, 0, 1, 1], [], []>} : vector<1x32xf32>, vector<32x128xf32>, vector<1x128xf32> -> vector<1x128xf32>
    %99 = arith.addf %97, %98 : vector<1x128xf32>
    %100 = vector.extract_strided_slice %99 {offsets = [0, 0], sizes = [1, 32], strides = [1, 1]} : vector<1x128xf32> to vector<1x32xf32>
    %101 = arith.negf %100 : vector<1x32xf32>
    %102 = math.exp %101 : vector<1x32xf32>
    %cst_33 = arith.constant 1.000000e+00 : f32
    %103 = vector.broadcast %cst_33 : f32 to vector<1x32xf32>
    %104 = arith.addf %103, %102 : vector<1x32xf32>
    %105 = arith.divf %103, %104 : vector<1x32xf32>
    %106 = vector.extract_strided_slice %99 {offsets = [0, 32], sizes = [1, 32], strides = [1, 1]} : vector<1x128xf32> to vector<1x32xf32>
    %107 = arith.negf %106 : vector<1x32xf32>
    %108 = math.exp %107 : vector<1x32xf32>
    %cst_34 = arith.constant 1.000000e+00 : f32
    %109 = vector.broadcast %cst_34 : f32 to vector<1x32xf32>
    %110 = arith.addf %109, %108 : vector<1x32xf32>
    %111 = arith.divf %109, %110 : vector<1x32xf32>
    %112 = vector.extract_strided_slice %99 {offsets = [0, 64], sizes = [1, 32], strides = [1, 1]} : vector<1x128xf32> to vector<1x32xf32>
    %113 = math.tanh %112 : vector<1x32xf32>
    %114 = vector.extract_strided_slice %99 {offsets = [0, 96], sizes = [1, 32], strides = [1, 1]} : vector<1x128xf32> to vector<1x32xf32>
    %115 = arith.negf %114 : vector<1x32xf32>
    %116 = math.exp %115 : vector<1x32xf32>
    %cst_35 = arith.constant 1.000000e+00 : f32
    %117 = vector.broadcast %cst_35 : f32 to vector<1x32xf32>
    %118 = arith.addf %117, %116 : vector<1x32xf32>
    %119 = arith.divf %117, %118 : vector<1x32xf32>
    %120 = arith.mulf %111, %94 : vector<1x32xf32>
    %121 = arith.mulf %105, %113 : vector<1x32xf32>
    %122 = arith.addf %120, %121 : vector<1x32xf32>
    %123 = math.tanh %122 : vector<1x32xf32>
    %124 = arith.mulf %119, %123 : vector<1x32xf32>
    %125 = vector.extract_strided_slice %37 {offsets = [3, 0], sizes = [1, 128], strides = [1, 1]} : vector<8x128xf32> to vector<1x128xf32>
    %cst_36 = arith.constant dense<0.000000e+00> : vector<1x128xf32>
    %126 = tpu.matmul %124, %38, %cst_36 {dimension_numbers = #tpu.dot_dimension_numbers<[1], [0], [0], [1], [0, 0, 1, 1], [], []>} : vector<1x32xf32>, vector<32x128xf32>, vector<1x128xf32> -> vector<1x128xf32>
    %127 = arith.addf %125, %126 : vector<1x128xf32>
    %128 = vector.extract_strided_slice %127 {offsets = [0, 0], sizes = [1, 32], strides = [1, 1]} : vector<1x128xf32> to vector<1x32xf32>
    %129 = arith.negf %128 : vector<1x32xf32>
    %130 = math.exp %129 : vector<1x32xf32>
    %cst_37 = arith.constant 1.000000e+00 : f32
    %131 = vector.broadcast %cst_37 : f32 to vector<1x32xf32>
    %132 = arith.addf %131, %130 : vector<1x32xf32>
    %133 = arith.divf %131, %132 : vector<1x32xf32>
    %134 = vector.extract_strided_slice %127 {offsets = [0, 32], sizes = [1, 32], strides = [1, 1]} : vector<1x128xf32> to vector<1x32xf32>
    %135 = arith.negf %134 : vector<1x32xf32>
    %136 = math.exp %135 : vector<1x32xf32>
    %cst_38 = arith.constant 1.000000e+00 : f32
    %137 = vector.broadcast %cst_38 : f32 to vector<1x32xf32>
    %138 = arith.addf %137, %136 : vector<1x32xf32>
    %139 = arith.divf %137, %138 : vector<1x32xf32>
    %140 = vector.extract_strided_slice %127 {offsets = [0, 64], sizes = [1, 32], strides = [1, 1]} : vector<1x128xf32> to vector<1x32xf32>
    %141 = math.tanh %140 : vector<1x32xf32>
    %142 = vector.extract_strided_slice %127 {offsets = [0, 96], sizes = [1, 32], strides = [1, 1]} : vector<1x128xf32> to vector<1x32xf32>
    %143 = arith.negf %142 : vector<1x32xf32>
    %144 = math.exp %143 : vector<1x32xf32>
    %cst_39 = arith.constant 1.000000e+00 : f32
    %145 = vector.broadcast %cst_39 : f32 to vector<1x32xf32>
    %146 = arith.addf %145, %144 : vector<1x32xf32>
    %147 = arith.divf %145, %146 : vector<1x32xf32>
    %148 = arith.mulf %139, %122 : vector<1x32xf32>
    %149 = arith.mulf %133, %141 : vector<1x32xf32>
    %150 = arith.addf %148, %149 : vector<1x32xf32>
    %151 = math.tanh %150 : vector<1x32xf32>
    %152 = arith.mulf %147, %151 : vector<1x32xf32>
    %153 = vector.extract_strided_slice %37 {offsets = [4, 0], sizes = [1, 128], strides = [1, 1]} : vector<8x128xf32> to vector<1x128xf32>
    %cst_40 = arith.constant dense<0.000000e+00> : vector<1x128xf32>
    %154 = tpu.matmul %152, %38, %cst_40 {dimension_numbers = #tpu.dot_dimension_numbers<[1], [0], [0], [1], [0, 0, 1, 1], [], []>} : vector<1x32xf32>, vector<32x128xf32>, vector<1x128xf32> -> vector<1x128xf32>
    %155 = arith.addf %153, %154 : vector<1x128xf32>
    %156 = vector.extract_strided_slice %155 {offsets = [0, 0], sizes = [1, 32], strides = [1, 1]} : vector<1x128xf32> to vector<1x32xf32>
    %157 = arith.negf %156 : vector<1x32xf32>
    %158 = math.exp %157 : vector<1x32xf32>
    %cst_41 = arith.constant 1.000000e+00 : f32
    %159 = vector.broadcast %cst_41 : f32 to vector<1x32xf32>
    %160 = arith.addf %159, %158 : vector<1x32xf32>
    %161 = arith.divf %159, %160 : vector<1x32xf32>
    %162 = vector.extract_strided_slice %155 {offsets = [0, 32], sizes = [1, 32], strides = [1, 1]} : vector<1x128xf32> to vector<1x32xf32>
    %163 = arith.negf %162 : vector<1x32xf32>
    %164 = math.exp %163 : vector<1x32xf32>
    %cst_42 = arith.constant 1.000000e+00 : f32
    %165 = vector.broadcast %cst_42 : f32 to vector<1x32xf32>
    %166 = arith.addf %165, %164 : vector<1x32xf32>
    %167 = arith.divf %165, %166 : vector<1x32xf32>
    %168 = vector.extract_strided_slice %155 {offsets = [0, 64], sizes = [1, 32], strides = [1, 1]} : vector<1x128xf32> to vector<1x32xf32>
    %169 = math.tanh %168 : vector<1x32xf32>
    %170 = vector.extract_strided_slice %155 {offsets = [0, 96], sizes = [1, 32], strides = [1, 1]} : vector<1x128xf32> to vector<1x32xf32>
    %171 = arith.negf %170 : vector<1x32xf32>
    %172 = math.exp %171 : vector<1x32xf32>
    %cst_43 = arith.constant 1.000000e+00 : f32
    %173 = vector.broadcast %cst_43 : f32 to vector<1x32xf32>
    %174 = arith.addf %173, %172 : vector<1x32xf32>
    %175 = arith.divf %173, %174 : vector<1x32xf32>
    %176 = arith.mulf %167, %150 : vector<1x32xf32>
    %177 = arith.mulf %161, %169 : vector<1x32xf32>
    %178 = arith.addf %176, %177 : vector<1x32xf32>
    %179 = math.tanh %178 : vector<1x32xf32>
    %180 = arith.mulf %175, %179 : vector<1x32xf32>
    %181 = vector.extract_strided_slice %37 {offsets = [5, 0], sizes = [1, 128], strides = [1, 1]} : vector<8x128xf32> to vector<1x128xf32>
    %cst_44 = arith.constant dense<0.000000e+00> : vector<1x128xf32>
    %182 = tpu.matmul %180, %38, %cst_44 {dimension_numbers = #tpu.dot_dimension_numbers<[1], [0], [0], [1], [0, 0, 1, 1], [], []>} : vector<1x32xf32>, vector<32x128xf32>, vector<1x128xf32> -> vector<1x128xf32>
    %183 = arith.addf %181, %182 : vector<1x128xf32>
    %184 = vector.extract_strided_slice %183 {offsets = [0, 0], sizes = [1, 32], strides = [1, 1]} : vector<1x128xf32> to vector<1x32xf32>
    %185 = arith.negf %184 : vector<1x32xf32>
    %186 = math.exp %185 : vector<1x32xf32>
    %cst_45 = arith.constant 1.000000e+00 : f32
    %187 = vector.broadcast %cst_45 : f32 to vector<1x32xf32>
    %188 = arith.addf %187, %186 : vector<1x32xf32>
    %189 = arith.divf %187, %188 : vector<1x32xf32>
    %190 = vector.extract_strided_slice %183 {offsets = [0, 32], sizes = [1, 32], strides = [1, 1]} : vector<1x128xf32> to vector<1x32xf32>
    %191 = arith.negf %190 : vector<1x32xf32>
    %192 = math.exp %191 : vector<1x32xf32>
    %cst_46 = arith.constant 1.000000e+00 : f32
    %193 = vector.broadcast %cst_46 : f32 to vector<1x32xf32>
    %194 = arith.addf %193, %192 : vector<1x32xf32>
    %195 = arith.divf %193, %194 : vector<1x32xf32>
    %196 = vector.extract_strided_slice %183 {offsets = [0, 64], sizes = [1, 32], strides = [1, 1]} : vector<1x128xf32> to vector<1x32xf32>
    %197 = math.tanh %196 : vector<1x32xf32>
    %198 = vector.extract_strided_slice %183 {offsets = [0, 96], sizes = [1, 32], strides = [1, 1]} : vector<1x128xf32> to vector<1x32xf32>
    %199 = arith.negf %198 : vector<1x32xf32>
    %200 = math.exp %199 : vector<1x32xf32>
    %cst_47 = arith.constant 1.000000e+00 : f32
    %201 = vector.broadcast %cst_47 : f32 to vector<1x32xf32>
    %202 = arith.addf %201, %200 : vector<1x32xf32>
    %203 = arith.divf %201, %202 : vector<1x32xf32>
    %204 = arith.mulf %195, %178 : vector<1x32xf32>
    %205 = arith.mulf %189, %197 : vector<1x32xf32>
    %206 = arith.addf %204, %205 : vector<1x32xf32>
    %207 = math.tanh %206 : vector<1x32xf32>
    %208 = arith.mulf %203, %207 : vector<1x32xf32>
    %209 = vector.extract_strided_slice %37 {offsets = [6, 0], sizes = [1, 128], strides = [1, 1]} : vector<8x128xf32> to vector<1x128xf32>
    %cst_48 = arith.constant dense<0.000000e+00> : vector<1x128xf32>
    %210 = tpu.matmul %208, %38, %cst_48 {dimension_numbers = #tpu.dot_dimension_numbers<[1], [0], [0], [1], [0, 0, 1, 1], [], []>} : vector<1x32xf32>, vector<32x128xf32>, vector<1x128xf32> -> vector<1x128xf32>
    %211 = arith.addf %209, %210 : vector<1x128xf32>
    %212 = vector.extract_strided_slice %211 {offsets = [0, 0], sizes = [1, 32], strides = [1, 1]} : vector<1x128xf32> to vector<1x32xf32>
    %213 = arith.negf %212 : vector<1x32xf32>
    %214 = math.exp %213 : vector<1x32xf32>
    %cst_49 = arith.constant 1.000000e+00 : f32
    %215 = vector.broadcast %cst_49 : f32 to vector<1x32xf32>
    %216 = arith.addf %215, %214 : vector<1x32xf32>
    %217 = arith.divf %215, %216 : vector<1x32xf32>
    %218 = vector.extract_strided_slice %211 {offsets = [0, 32], sizes = [1, 32], strides = [1, 1]} : vector<1x128xf32> to vector<1x32xf32>
    %219 = arith.negf %218 : vector<1x32xf32>
    %220 = math.exp %219 : vector<1x32xf32>
    %cst_50 = arith.constant 1.000000e+00 : f32
    %221 = vector.broadcast %cst_50 : f32 to vector<1x32xf32>
    %222 = arith.addf %221, %220 : vector<1x32xf32>
    %223 = arith.divf %221, %222 : vector<1x32xf32>
    %224 = vector.extract_strided_slice %211 {offsets = [0, 64], sizes = [1, 32], strides = [1, 1]} : vector<1x128xf32> to vector<1x32xf32>
    %225 = math.tanh %224 : vector<1x32xf32>
    %226 = vector.extract_strided_slice %211 {offsets = [0, 96], sizes = [1, 32], strides = [1, 1]} : vector<1x128xf32> to vector<1x32xf32>
    %227 = arith.negf %226 : vector<1x32xf32>
    %228 = math.exp %227 : vector<1x32xf32>
    %cst_51 = arith.constant 1.000000e+00 : f32
    %229 = vector.broadcast %cst_51 : f32 to vector<1x32xf32>
    %230 = arith.addf %229, %228 : vector<1x32xf32>
    %231 = arith.divf %229, %230 : vector<1x32xf32>
    %232 = arith.mulf %223, %206 : vector<1x32xf32>
    %233 = arith.mulf %217, %225 : vector<1x32xf32>
    %234 = arith.addf %232, %233 : vector<1x32xf32>
    %235 = math.tanh %234 : vector<1x32xf32>
    %236 = arith.mulf %231, %235 : vector<1x32xf32>
    %237 = vector.extract_strided_slice %37 {offsets = [7, 0], sizes = [1, 128], strides = [1, 1]} : vector<8x128xf32> to vector<1x128xf32>
    %cst_52 = arith.constant dense<0.000000e+00> : vector<1x128xf32>
    %238 = tpu.matmul %236, %38, %cst_52 {dimension_numbers = #tpu.dot_dimension_numbers<[1], [0], [0], [1], [0, 0, 1, 1], [], []>} : vector<1x32xf32>, vector<32x128xf32>, vector<1x128xf32> -> vector<1x128xf32>
    %239 = arith.addf %237, %238 : vector<1x128xf32>
    %240 = vector.extract_strided_slice %239 {offsets = [0, 0], sizes = [1, 32], strides = [1, 1]} : vector<1x128xf32> to vector<1x32xf32>
    %241 = arith.negf %240 : vector<1x32xf32>
    %242 = math.exp %241 : vector<1x32xf32>
    %cst_53 = arith.constant 1.000000e+00 : f32
    %243 = vector.broadcast %cst_53 : f32 to vector<1x32xf32>
    %244 = arith.addf %243, %242 : vector<1x32xf32>
    %245 = arith.divf %243, %244 : vector<1x32xf32>
    %246 = vector.extract_strided_slice %239 {offsets = [0, 32], sizes = [1, 32], strides = [1, 1]} : vector<1x128xf32> to vector<1x32xf32>
    %247 = arith.negf %246 : vector<1x32xf32>
    %248 = math.exp %247 : vector<1x32xf32>
    %cst_54 = arith.constant 1.000000e+00 : f32
    %249 = vector.broadcast %cst_54 : f32 to vector<1x32xf32>
    %250 = arith.addf %249, %248 : vector<1x32xf32>
    %251 = arith.divf %249, %250 : vector<1x32xf32>
    %252 = vector.extract_strided_slice %239 {offsets = [0, 64], sizes = [1, 32], strides = [1, 1]} : vector<1x128xf32> to vector<1x32xf32>
    %253 = math.tanh %252 : vector<1x32xf32>
    %254 = vector.extract_strided_slice %239 {offsets = [0, 96], sizes = [1, 32], strides = [1, 1]} : vector<1x128xf32> to vector<1x32xf32>
    %255 = arith.negf %254 : vector<1x32xf32>
    %256 = math.exp %255 : vector<1x32xf32>
    %cst_55 = arith.constant 1.000000e+00 : f32
    %257 = vector.broadcast %cst_55 : f32 to vector<1x32xf32>
    %258 = arith.addf %257, %256 : vector<1x32xf32>
    %259 = arith.divf %257, %258 : vector<1x32xf32>
    %260 = arith.mulf %251, %234 : vector<1x32xf32>
    %261 = arith.mulf %245, %253 : vector<1x32xf32>
    %262 = arith.addf %260, %261 : vector<1x32xf32>
    %263 = math.tanh %262 : vector<1x32xf32>
    %264 = arith.mulf %259, %263 : vector<1x32xf32>
    %265 = tpu.concatenate %68, %96, %124, %152, %180, %208, %236, %264 in 0 : vector<1x32xf32>, vector<1x32xf32>, vector<1x32xf32>, vector<1x32xf32>, vector<1x32xf32>, vector<1x32xf32>, vector<1x32xf32>, vector<1x32xf32> -> vector<8x32xf32>
    %c0_56 = arith.constant 0 : index
    %c0_57 = arith.constant 0 : index
    %266 = vector.load %arg5[%c0_56, %c0_57] : memref<32x8xf32, #tpu.memory_space<vmem>>, vector<32x8xf32>
    %cst_58 = arith.constant dense<0.000000e+00> : vector<8x8xf32>
    %267 = tpu.matmul %265, %266, %cst_58 {dimension_numbers = #tpu.dot_dimension_numbers<[1], [0], [0], [1], [0, 0, 1, 1], [], []>} : vector<8x32xf32>, vector<32x8xf32>, vector<8x8xf32> -> vector<8x8xf32>
    %c0_59 = arith.constant 0 : index
    %c0_60 = arith.constant 0 : index
    %268 = vector.load %arg6[%c0_59, %c0_60] : memref<1x8xf32, #tpu.memory_space<vmem>>, vector<1x8xf32>
    %269 = vector.broadcast %268 : vector<1x8xf32> to vector<8x8xf32>
    %270 = arith.addf %267, %269 : vector<8x8xf32>
    %cst_61 = arith.constant dense<0xFF800000> : vector<8xf32>
    %271 = vector.multi_reduction <maximumf>, %270, %cst_61 [1] : vector<8x8xf32> to vector<8xf32>
    %272 = vector.shape_cast %271 : vector<8xf32> to vector<8x1xf32>
    %273 = vector.broadcast %272 : vector<8x1xf32> to vector<8x8xf32>
    %274 = arith.subf %270, %273 : vector<8x8xf32>
    %275 = math.exp %274 : vector<8x8xf32>
    %cst_62 = arith.constant dense<0.000000e+00> : vector<8xf32>
    %276 = vector.multi_reduction <add>, %275, %cst_62 [1] : vector<8x8xf32> to vector<8xf32>
    %277 = vector.shape_cast %276 : vector<8xf32> to vector<8x1xf32>
    %278 = math.log %277 : vector<8x1xf32>
    %279 = vector.broadcast %278 : vector<8x1xf32> to vector<8x8xf32>
    %280 = arith.subf %274, %279 : vector<8x8xf32>
    %c0_63 = arith.constant 0 : index
    %c0_64 = arith.constant 0 : index
    %281 = vector.load %arg7[%c0_63, %c0_64] : memref<8x8xf32, #tpu.memory_space<vmem>>, vector<8x8xf32>
    tpu.vector_store %arg7[%c0_63, %c0_64], %280 {strides = array<i32>} : memref<8x8xf32, #tpu.memory_space<vmem>>, vector<8x8xf32>,
    return
  }
}

</mosaic_0001>

<bundles_post_ra>
// kernel: lstm_tagger_forward.1
= control target key start
LH: loop header
LB: loop body
LE: loop exit
PB: predicated region body
PF: predicated region fallthrough
CT: control target
= control target key end

     0   :  { %12 = vsyncpa [#allocation5], 0  ;;  %s1848_s0 = inlined_call_operand.vmem [shape: s32[8], index: 0, kind: input, shape index: {}]   ;;  %s1849_s1 = inlined_call_operand.hbm [shape: f32[16,1,32], index: 1, kind: input, shape index: {}]   ;;  %s1850_s2 = inlined_call_operand.vmem [shape: f32[32,128], index: 2, kind: input, shape index: {}]   ;;  %s1851_s3 = inlined_call_operand.vmem [shape: f32[32,128], index: 3, kind: input, shape index: {}]   ;;  %s1852_s4 = inlined_call_operand.vmem [shape: f32[1,128], index: 4, kind: input, shape index: {}]   ;;  %s1853_s5 = inlined_call_operand.vmem [shape: f32[32,8], index: 5, kind: input, shape index: {}]   ;;  %s1854_s6 = inlined_call_operand.vmem [shape: f32[1,8], index: 6, kind: input, shape index: {}]   ;;  %s1855_s7 = inlined_call_operand.hbm [shape: f32[8,8], index: 7, kind: output, shape index: {}]  }
   0x1   :  { %13 = vsyncpa [#allocation3], 0 }
   0x2   :  { %14 = vsyncpa [#allocation4], 0  ;;  %s21_s26 = sshll.u32 %s1848_s0, 4  ;;  %s22_s26 = int_to_ptr.vmem [resolvable:$true] %s21_s26 }
   0x3   :  { %s1531_s27 = scalar_lea.vmem %s22_s26, 16  ;;  %p1536_p1 = scmp.lt.s32.totalorder %s22_s26, %s22_s26 }
   0x4   :  { %p1532_p0 = scmp.ne.s32.totalorder %s22_s26, %s1531_s27  ;;  %p1537_p2 = scmp.lt.s32.totalorder %s1531_s27, %s1531_s27 }
   0x6   :  { %p1538_p3 = por %p1537_p2, %p1536_p1 }
   0x8   :  { %p1539_p4 = pnand %p1538_p3, %p1532_p0 }
   0xa   :  { %1542 = shalt.err (!%p1539_p4)
}
   0xb   :  { %s1593_s28 = smov [#allocation2]   ;;  %s1594_s29 = smov [#allocation6]  }
   0xc   :  { %24 = dma.vmem_to_smem %s22_s26, 16, %s1593_s28, [#allocation5]  }
   0xd   :  { %s30_s30 = sshll.u32 %s1594_s29, 4  ;;  %s1543_s10 = scalar_lea.hbm %s1849_s1, 256  ;;  %s31_s30 = int_to_ptr.vmem [resolvable:$true] %s30_s30 }
   0xe   :  { %p1544_p5 = scmp.ne.s32.totalorder %s1849_s1, %s1543_s10  ;;  %p1547_p6 = scmp.lt.u32.totalorder %s1543_s10, %s1849_s1 }
  0x10   :  { %p1549_p7 = pnand %p1547_p6, %p1544_p5 }
  0x12   :  { %1552 = shalt.err (!%p1549_p7)
}
  0x13   :  { %s1553_s14 = scalar_lea.vmem %s31_s30, 256  ;;  %p1558_p9 = scmp.lt.s32.totalorder %s31_s30, %s31_s30 }
  0x14   :  { %p1554_p8 = scmp.ne.s32.totalorder %s31_s30, %s1553_s14  ;;  %p1559_p10 = scmp.lt.s32.totalorder %s1553_s14, %s1553_s14 }
  0x16   :  { %p1560_p11 = por %p1559_p10, %p1558_p9 }
  0x18   :  { %p1561_p12 = pnand %p1560_p11, %p1554_p8 }
  0x1a   :  { %1564 = shalt.err (!%p1561_p12)
}
  0x1b   :  { %s1595_s15 = smov 16   ;;  %s1596_s16 = smov 1  }
  0x1c   :  { %36 = dma.hbm_to_vmem [thread:$0]  %s1849_s1, 256, %s31_s30, [#allocation3], %s1595_s15, %s1595_s15, %s1596_s16  }
  0x1d   :  { %1587 = dma.done.wait [#allocation5], 16  }
  0x1e   :  { %1588 = vsyncadd [#allocation5], 4294967280 }
  0x1f   :  { %1589 = dma.done.wait [#allocation3], 256  }
  0x20   :  { %1590 = vsyncadd [#allocation3], 4294967040 }
  0x21   :  { %53 = sfence }
  0x22   :  { %v134_v0 = vld [vmem:[%s1850_s2] sm:$0xff]  ;;  %v135_v1 = vld [vmem:[%s1850_s2 + $0x8] sm:$0xff]  ;;  %v1597_v3 = vmov 0.0|0.0   ;;  %v136_v6 = vld [vmem:[%s1850_s2 + $0x10] sm:$0xff]  ;;  %s54_s30 = sld [smem:[#allocation2]]  ;;  %vm1598_vm0 = vmmov 0  }
  0x23   :  { %v219_v2 = vld [vmem:[%s1851_s3] sm:$0xff]  ;;  %1393 = vmatprep.subr.bf16.mxu0 %v1597_v3  ;;  %v1394_v4 = vpack.c.bf16 %v135_v1, %v134_v0  ;;  %1399 = vmatprep.subr.bf16.mxu1 %v1597_v3  ;;  %v220_v5 = vld [vmem:[%s1851_s3 + $0x8] sm:$0xff]  ;;  %v137_v7 = vld [vmem:[%s1850_s2 + $0x18] sm:$0xff]  ;;  %v1599_v11 = vmov 0.0   ;;  %s1200_s12 = sld [smem:[#allocation2 + $0x1]]  ;;  %s1201_s0 = sld [smem:[#allocation2 + $0x2]] }
  0x24   :  { %v1678_v8 = vpack.c.bf16 %v220_v5, %v219_v2  ;;  %v221_v9 = vld [vmem:[%s1851_s3 + $0x10] sm:$0xff]  ;;  %v222_v10 = vld [vmem:[%s1851_s3 + $0x18] sm:$0xff]  ;;  %1291 = vmatprep.mubr.msk.f32.mxu0 %vm1598_vm0, %v1599_v11  ;;  %1302 = vmatprep.mubr.msk.f32.mxu1 %vm1598_vm0, %v1599_v11  ;;  %v1397_v12 = vpack.c.bf16 %v137_v7, %v136_v6  ;;  %s1202_s2 = sld [smem:[#allocation2 + $0x3]]  ;;  %s1203_s13 = sld [smem:[#allocation2 + $0x4]]  ;;  %vm120_vm1 = vcmask 1040384   ;;  %vm122_vm2 = vcmask 1041408  }
  0x25   :  { %1395 = vmatpush3.bf16.msra.mxu0 %v1394_v4  ;;  %v1692_v13 = vpack.c.bf16 %v222_v10, %v221_v9  ;;  %s1204_s3 = sld [smem:[#allocation2 + $0x5]]  ;;  %s1205_s14 = sld [smem:[#allocation2 + $0x6]]  ;;  %vm124_vm3 = vcmask 1042432   ;;  %vm126_vm4 = vcmask 1043456   ;;  %vm128_vm5 = vcmask 1044480  }
  0x26   :  { %1401 = vmatpush3.bf16.msra.mxu1 %v1678_v8  ;;  %1396 = vmatprep.subr.bf16.mxu0 %v1597_v3  ;;  %s1695_s15 = sld [smem:[#allocation2 + $0x7]]  ;;  %vm130_vm6 = vcmask 1045504   ;;  %vm132_vm7 = vcmask 1046528   ;;  %vm145_vm8 = vcmask 261120   ;;  %v1214_v31 = vld [vmem:[%s1852_s4] ss:$0 sm:$0xff] }
  0x27   :  { %1402 = vmatprep.subr.bf16.mxu1 %v1597_v3  ;;  %s1600_s25 = smov 64   ;;  %s1601_s4 = smov 32   ;;  %vm1162_vm9 = vcmask 64512  }
  0x28   :  { %s55_s16 = scalar_lea.vmem [#allocation6], %s54_s30 }
  0x29   :  { %1398 = vmatpush3.bf16.msra.mxu0 %v1397_v12  ;;  %v56_v14 = vld [vmem:[%s55_s16] sm:$0x1]  ;;  %s58_s17 = scalar_lea.vmem [#allocation6], %s1200_s12  ;;  %s61_s18 = scalar_lea.vmem [#allocation6], %s1201_s0 }
  0x2a   :  { %1404 = vmatpush3.bf16.msra.mxu1 %v1692_v13  ;;  %1405 = vmatprep.subr.bf16.mxu0 %v1597_v3  ;;  %v1207_v15 = vld [vmem:[%s58_s17] ss:$0 sm:$0xff]  ;;  %s64_s19 = scalar_lea.vmem [#allocation6], %s1202_s2  ;;  %s67_s20 = scalar_lea.vmem [#allocation6], %s1203_s13 }
  0x2b   :  { %v1208_v16 = vld [vmem:[%s61_s18] ss:$0 sm:$0xff]  ;;  %1411 = vmatprep.subr.bf16.mxu1 %v1597_v3  ;;  %v121_v19 = vsel %vm120_vm1, %v56_v14, %v1207_v15  ;;  %s70_s21 = scalar_lea.vmem [#allocation6], %s1204_s3  ;;  %s73_s22 = scalar_lea.vmem [#allocation6], %s1205_s14 }
  0x2c   :  { %v1209_v17 = vld [vmem:[%s64_s19] ss:$0 sm:$0xff]  ;;  %v123_v21 = vsel %vm122_vm2, %v121_v19, %v1208_v16  ;;  %s76_s23 = scalar_lea.vmem [#allocation6], %s1695_s15 }
  0x2d   :  { %v1210_v18 = vld [vmem:[%s67_s20] ss:$0 sm:$0xff]  ;;  %1303 = vmatmul.mubr.f32.vlgmr.msra.gmra.mrb[0].mxu1 %v1599_v11  ;;  %v125_v23 = vsel %vm124_vm3, %v123_v21, %v1209_v17 }
  0x2e   :  { %v1211_v20 = vld [vmem:[%s70_s21] ss:$0 sm:$0xff]  ;;  %1413 = vmatpush3.bf16.msra.mxu1 %v1678_v8  ;;  %1324 = vmatprep.mubr.msk.f32.mxu1 %vm1598_vm0, %v1599_v11  ;;  %v127_v25 = vsel %vm126_vm4, %v125_v23, %v1210_v18 }
  0x2f   :  { %v1212_v22 = vld [vmem:[%s73_s22] ss:$0 sm:$0xff]  ;;  %1414 = vmatprep.subr.bf16.mxu1 %v1597_v3  ;;  %v129_v26 = vsel %vm128_vm5, %v127_v25, %v1211_v20 }
  0x30   :  { %v1213_v24 = vld [vmem:[%s76_s23] ss:$0 sm:$0xff]  ;;  %v131_v27 = vsel %vm130_vm6, %v129_v26, %v1212_v22 }
  0x31   :  { %v133_v28 = vsel %vm132_vm7, %v131_v27, %v1213_v24 }
  0x32   :  { %1416 = vmatpush3.bf16.msra.mxu1 %v1692_v13  ;;  %1292 = vmatmul.mubr.msk.f32.vlgmr.msra.gmra.mrb[0].mxu0 %vm145_vm8, %v133_v28 }
  0x33   :  { %1423 = vmatprep.subr.bf16.mxu1 %v1597_v3  ;;  %1407 = vmatpush3.bf16.msra.mxu0 %v1678_v8 }
  0x34   :  { %1313 = vmatprep.mubr.msk.f32.mxu0 %vm1598_vm0, %v1599_v11  ;;  %1408 = vmatprep.subr.bf16.mxu0 %v1597_v3 }
  0x37   :  { %1410 = vmatpush3.bf16.msra.mxu0 %v1692_v13 }
  0x38   :  { %1417 = vmatprep.subr.bf16.mxu0 %v1597_v3 }
 0x100   :  { %v292_v29 = vpop.f32.mrb[0].mxu1 }
 0x101   :  { %v1304_v30 = vpop.f32.mrb[1].mxu1 }
 0x105   :  { %v215_v32 = vpop.f32.mrb[0].mxu0 }
 0x106   :  { %v1725_v33 = vadd.f32 %v1214_v31, %v215_v32  ;;  %v1293_v34 = vpop.f32.mrb[1].mxu0 }
 0x108   :  { %v296_v35 = vadd.f32 %v292_v29, %v1725_v33 }
 0x10a   :  { %1463 = vtanh.f32 %v296_v35  ;;  %v1216_v37 = vmul.f32 -1.442695, %v296_v35 }
 0x10c   :  { %1465 = vpow2.f32 %v1216_v37 }
 0x114   :  { %v1464_v36 = vpop.eup %1463 }
 0x115   :  { %306 = vrot.lane.b32.xlu0 %v1464_v36, %s1600_s25 }
 0x116   :  { %v1466_v38 = vpop.eup %1465 }
 0x117   :  { %v300_v39 = vadd.f32 1.0, %v1466_v38 }
 0x119   :  { %1467 = vrcp.f32 %v300_v39 }
 0x123   :  { %v1468_v40 = vpop.eup %1467 }
 0x124   :  { %v304_v43 = vmul.f32 0.0, %v1468_v40 }
 0x187   :  { %v307_v41 = vpop.permute.xlu0 %306 }
 0x188   :  { %v309_v42 = vmul.f32 %v1468_v40, %v307_v41 }
 0x18a   :  { %311 = vrot.lane.b32.xlu0 %v309_v42, %s1601_s4 }
 0x1fc   :  { %v312_v44 = vpop.permute.xlu0 %311 }
 0x1fd   :  { %v314_v45 = vadd.f32 %v312_v44, %v304_v43 }
 0x1ff   :  { %1469 = vtanh.f32 %v314_v45  ;;  %v408_v61 = vrot.slane %v314_v45, 7 }
 0x209   :  { %v1470_v46 = vpop.eup %1469 }
 0x20a   :  { %317 = vrot.lane.b32.xlu1 %v1470_v46, %s1600_s25 }
 0x27c   :  { %v318_v47 = vpop.permute.xlu1 %317 }
 0x27d   :  { %v1731_v48 = vmul.f32 %v1468_v40, %v318_v47 }
 0x27f   :  { %322 = vrot.lane.b32.xlu1 %v1731_v48, %s1601_s4 }
 0x2f1   :  { %v323_v49 = vpop.permute.xlu1 %322 }
 0x2f2   :  { %1314 = vmatmul.mubr.msk.f32.vlgmr.msra.gmra.mrb[2].mxu0 %vm145_vm8, %v323_v49 }
 0x2f3   :  { %1419 = vmatpush3.bf16.msra.mxu0 %v1678_v8  ;;  %1335 = vmatprep.mubr.msk.f32.mxu0 %vm1598_vm0, %v1599_v11 }
 0x2f4   :  { %1420 = vmatprep.subr.bf16.mxu0 %v1597_v3 }
 0x2f7   :  { %1422 = vmatpush3.bf16.msra.mxu0 %v1692_v13 }
 0x2f8   :  { %1429 = vmatprep.subr.bf16.mxu0 %v1597_v3 }
 0x3c5   :  { %v392_v50 = vpop.f32.mrb[2].mxu0 }
 0x3c6   :  { %v397_v51 = vrot.slane %v392_v50, 7  ;;  %v1315_v52 = vpop.f32.mrb[3].mxu0 }
 0x3c8   :  { %v399_v53 = vadd.f32 %v397_v51, %v1725_v33 }
 0x3ca   :  { %1471 = vtanh.f32 %v399_v53  ;;  %v1218_v55 = vmul.f32 -1.442695, %v399_v53 }
 0x3cc   :  { %1473 = vpow2.f32 %v1218_v55 }
 0x3d4   :  { %v1472_v54 = vpop.eup %1471 }
 0x3d5   :  { %412 = vrot.lane.b32.xlu0 %v1472_v54, %s1600_s25 }
 0x3d6   :  { %v1474_v56 = vpop.eup %1473 }
 0x3d7   :  { %v403_v57 = vadd.f32 1.0, %v1474_v56 }
 0x3d9   :  { %1475 = vrcp.f32 %v403_v57 }
 0x3e3   :  { %v1476_v58 = vpop.eup %1475 }
 0x3e4   :  { %v410_v62 = vmul.f32 %v1476_v58, %v408_v61 }
 0x447   :  { %v413_v59 = vpop.permute.xlu0 %412 }
 0x448   :  { %v415_v60 = vmul.f32 %v1476_v58, %v413_v59 }
 0x44a   :  { %417 = vrot.lane.b32.xlu1 %v415_v60, %s1601_s4 }
 0x4bc   :  { %v418_v63 = vpop.permute.xlu1 %417 }
 0x4bd   :  { %v420_v0 = vadd.f32 %v418_v63, %v410_v62 }
 0x4bf   :  { %1477 = vtanh.f32 %v420_v0  ;;  %v515_v21 = vrot.slane %v420_v0, 7 }
 0x4c9   :  { %v1478_v1 = vpop.eup %1477 }
 0x4ca   :  { %423 = vrot.lane.b32.xlu0 %v1478_v1, %s1600_s25 }
 0x53c   :  { %v424_v2 = vpop.permute.xlu0 %423 }
 0x53d   :  { %v426_v4 = vmul.f32 %v1476_v58, %v424_v2 }
 0x53f   :  { %v428_v5 = vrot.slane %v426_v4, 1  ;;  %v1069_v28 = vsel %vm120_vm1, %v1731_v48, %v426_v4 }
 0x541   :  { %429 = vrot.lane.b32.xlu1 %v428_v5, %s1601_s4 }
 0x5b3   :  { %v430_v6 = vpop.permute.xlu1 %429 }
 0x5b4   :  { %1325 = vmatmul.mubr.msk.f32.vlgmr.msra.gmra.mrb[2].mxu1 %vm145_vm8, %v430_v6 }
 0x5b5   :  { %1425 = vmatpush3.bf16.msra.mxu1 %v1678_v8  ;;  %1346 = vmatprep.mubr.msk.f32.mxu1 %vm1598_vm0, %v1599_v11 }
 0x5b6   :  { %1426 = vmatprep.subr.bf16.mxu1 %v1597_v3 }
 0x5b9   :  { %1428 = vmatpush3.bf16.msra.mxu1 %v1692_v13 }
 0x5ba   :  { %1435 = vmatprep.subr.bf16.mxu1 %v1597_v3 }
 0x687   :  { %v499_v7 = vpop.f32.mrb[2].mxu1 }
 0x688   :  { %v504_v9 = vrot.slane %v499_v7, 6  ;;  %v1326_v10 = vpop.f32.mrb[3].mxu1 }
 0x68a   :  { %v506_v12 = vadd.f32 %v504_v9, %v1725_v33 }
 0x68c   :  { %1479 = vtanh.f32 %v506_v12  ;;  %v1220_v15 = vmul.f32 -1.442695, %v506_v12 }
 0x68e   :  { %1481 = vpow2.f32 %v1220_v15 }
 0x696   :  { %v1480_v14 = vpop.eup %1479 }
 0x697   :  { %519 = vrot.lane.b32.xlu0 %v1480_v14, %s1600_s25 }
 0x698   :  { %v1482_v16 = vpop.eup %1481 }
 0x699   :  { %v510_v17 = vadd.f32 1.0, %v1482_v16 }
 0x69b   :  { %1483 = vrcp.f32 %v510_v17 }
 0x6a5   :  { %v1484_v18 = vpop.eup %1483 }
 0x6a6   :  { %v517_v22 = vmul.f32 %v1484_v18, %v515_v21 }
 0x709   :  { %v520_v19 = vpop.permute.xlu0 %519 }
 0x70a   :  { %v522_v20 = vmul.f32 %v1484_v18, %v520_v19 }
 0x70c   :  { %524 = vrot.lane.b32.xlu1 %v522_v20, %s1601_s4 }
 0x77e   :  { %v525_v23 = vpop.permute.xlu1 %524 }
 0x77f   :  { %v527_v24 = vadd.f32 %v525_v23, %v517_v22 }
 0x781   :  { %1485 = vtanh.f32 %v527_v24  ;;  %v622_v44 = vrot.slane %v527_v24, 7 }
 0x78b   :  { %v1486_v25 = vpop.eup %1485 }
 0x78c   :  { %530 = vrot.lane.b32.xlu0 %v1486_v25, %s1600_s25 }
 0x7fe   :  { %v531_v26 = vpop.permute.xlu0 %530 }
 0x7ff   :  { %v533_v27 = vmul.f32 %v1484_v18, %v531_v26 }
 0x801   :  { %v535_v29 = vrot.slane %v533_v27, 2  ;;  %v1070_v30 = vsel %vm122_vm2, %v1069_v28, %v533_v27 }
 0x803   :  { %536 = vrot.lane.b32.xlu1 %v535_v29, %s1601_s4 }
 0x875   :  { %v537_v31 = vpop.permute.xlu1 %536 }
 0x876   :  { %1336 = vmatmul.mubr.msk.f32.vlgmr.msra.gmra.mrb[4].mxu0 %vm145_vm8, %v537_v31 }
 0x877   :  { %1431 = vmatpush3.bf16.msra.mxu0 %v1678_v8  ;;  %1357 = vmatprep.mubr.msk.f32.mxu0 %vm1598_vm0, %v1599_v11 }
 0x878   :  { %1432 = vmatprep.subr.bf16.mxu0 %v1597_v3 }
 0x87b   :  { %1434 = vmatpush3.bf16.msra.mxu0 %v1692_v13 }
 0x87c   :  { %1441 = vmatprep.subr.bf16.mxu0 %v1597_v3 }
 0x949   :  { %v606_v32 = vpop.f32.mrb[4].mxu0 }
 0x94a   :  { %v611_v34 = vrot.slane %v606_v32, 5  ;;  %v1337_v35 = vpop.f32.mrb[5].mxu0 }
 0x94c   :  { %v613_v36 = vadd.f32 %v611_v34, %v1725_v33 }
 0x94e   :  { %1487 = vtanh.f32 %v613_v36  ;;  %v1222_v38 = vmul.f32 -1.442695, %v613_v36 }
 0x950   :  { %1489 = vpow2.f32 %v1222_v38 }
 0x958   :  { %v1488_v37 = vpop.eup %1487 }
 0x959   :  { %626 = vrot.lane.b32.xlu0 %v1488_v37, %s1600_s25 }
 0x95a   :  { %v1490_v39 = vpop.eup %1489 }
 0x95b   :  { %v617_v40 = vadd.f32 1.0, %v1490_v39 }
 0x95d   :  { %1491 = vrcp.f32 %v617_v40 }
 0x967   :  { %v1492_v41 = vpop.eup %1491 }
 0x968   :  { %v624_v45 = vmul.f32 %v1492_v41, %v622_v44 }
 0x9cb   :  { %v627_v42 = vpop.permute.xlu0 %626 }
 0x9cc   :  { %v629_v43 = vmul.f32 %v1492_v41, %v627_v42 }
 0x9ce   :  { %631 = vrot.lane.b32.xlu1 %v629_v43, %s1601_s4 }
 0xa40   :  { %v632_v46 = vpop.permute.xlu1 %631 }
 0xa41   :  { %v634_v47 = vadd.f32 %v632_v46, %v624_v45 }
 0xa43   :  { %1493 = vtanh.f32 %v634_v47  ;;  %v729_v1 = vrot.slane %v634_v47, 7 }
 0xa4d   :  { %v1494_v48 = vpop.eup %1493 }
 0xa4e   :  { %637 = vrot.lane.b32.xlu0 %v1494_v48, %s1600_s25 }
 0xac0   :  { %v638_v49 = vpop.permute.xlu0 %637 }
 0xac1   :  { %v640_v50 = vmul.f32 %v1492_v41, %v638_v49 }
 0xac3   :  { %v642_v51 = vrot.slane %v640_v50, 3  ;;  %v1071_v52 = vsel %vm124_vm3, %v1070_v30, %v640_v50 }
 0xac5   :  { %643 = vrot.lane.b32.xlu1 %v642_v51, %s1601_s4 }
 0xb37   :  { %v644_v53 = vpop.permute.xlu1 %643 }
 0xb38   :  { %1347 = vmatmul.mubr.msk.f32.vlgmr.msra.gmra.mrb[4].mxu1 %vm145_vm8, %v644_v53 }
 0xb39   :  { %1437 = vmatpush3.bf16.msra.mxu1 %v1678_v8  ;;  %1368 = vmatprep.mubr.msk.f32.mxu1 %vm1598_vm0, %v1599_v11 }
 0xb3a   :  { %1438 = vmatprep.subr.bf16.mxu1 %v1597_v3 }
 0xb3d   :  { %1440 = vmatpush3.bf16.msra.mxu1 %v1692_v13 }
 0xb3e   :  { %1447 = vmatprep.subr.bf16.mxu1 %v1597_v3 }
 0xc0b   :  { %v713_v54 = vpop.f32.mrb[4].mxu1 }
 0xc0c   :  { %v718_v55 = vrot.slane %v713_v54, 4  ;;  %v1348_v56 = vpop.f32.mrb[5].mxu1 }
 0xc0e   :  { %v720_v57 = vadd.f32 %v718_v55, %v1725_v33 }
 0xc10   :  { %1495 = vtanh.f32 %v720_v57  ;;  %v1224_v59 = vmul.f32 -1.442695, %v720_v57 }
 0xc12   :  { %1497 = vpow2.f32 %v1224_v59 }
 0xc1a   :  { %v1496_v58 = vpop.eup %1495 }
 0xc1b   :  { %733 = vrot.lane.b32.xlu0 %v1496_v58, %s1600_s25 }
 0xc1c   :  { %v1498_v60 = vpop.eup %1497 }
 0xc1d   :  { %v724_v61 = vadd.f32 1.0, %v1498_v60 }
 0xc1f   :  { %1499 = vrcp.f32 %v724_v61 }
 0xc29   :  { %v1500_v62 = vpop.eup %1499 }
 0xc2a   :  { %v731_v2 = vmul.f32 %v1500_v62, %v729_v1 }
 0xc8d   :  { %v734_v63 = vpop.permute.xlu0 %733 }
 0xc8e   :  { %v736_v0 = vmul.f32 %v1500_v62, %v734_v63 }
 0xc90   :  { %738 = vrot.lane.b32.xlu1 %v736_v0, %s1601_s4 }
 0xd02   :  { %v739_v4 = vpop.permute.xlu1 %738 }
 0xd03   :  { %v741_v5 = vadd.f32 %v739_v4, %v731_v2 }
 0xd05   :  { %1501 = vtanh.f32 %v741_v5 }
 0xd0f   :  { %v1502_v6 = vpop.eup %1501 }
 0xd10   :  { %744 = vrot.lane.b32.xlu0 %v1502_v6, %s1600_s25 }
 0xd82   :  { %v745_v7 = vpop.permute.xlu0 %744 }
 0xd83   :  { %v747_v9 = vmul.f32 %v1500_v62, %v745_v7  ;;  %v1077_v7 = vld [vmem:[%s1853_s5 + $0x8] sm:$0xff] }
 0xd85   :  { %v749_v10 = vrot.slane %v747_v9, 4  ;;  %v1072_v12 = vsel %vm126_vm4, %v1071_v52, %v747_v9  ;;  %v1078_v9 = vld [vmem:[%s1853_s5 + $0x10] sm:$0xff] }
 0xd87   :  { %750 = vrot.lane.b32.xlu1 %v749_v10, %s1601_s4 }
 0xdf9   :  { %v751_v14 = vpop.permute.xlu1 %750 }
 0xdfa   :  { %1358 = vmatmul.mubr.msk.f32.vlgmr.msra.gmra.mrb[6].mxu0 %vm145_vm8, %v751_v14 }
 0xdfb   :  { %1443 = vmatpush3.bf16.msra.mxu0 %v1678_v8  ;;  %1379 = vmatprep.mubr.msk.f32.mxu0 %vm1598_vm0, %v1599_v11 }
 0xdfc   :  { %1444 = vmatprep.subr.bf16.mxu0 %v1597_v3 }
 0xdff   :  { %1446 = vmatpush3.bf16.msra.mxu0 %v1692_v13  ;;  %v836_v13 = vrot.slane %v741_v5, 7 }
 0xecd   :  { %v820_v15 = vpop.f32.mrb[6].mxu0 }
 0xece   :  { %v825_v16 = vrot.slane %v820_v15, 3  ;;  %v1359_v17 = vpop.f32.mrb[7].mxu0 }
 0xed0   :  { %v827_v18 = vadd.f32 %v825_v16, %v1725_v33 }
 0xed2   :  { %1503 = vtanh.f32 %v827_v18  ;;  %v1226_v20 = vmul.f32 -1.442695, %v827_v18 }
 0xed4   :  { %1505 = vpow2.f32 %v1226_v20  ;;  %v1231_v20 = vld [vmem:[%s1854_s6] ss:$0 sm:$0xff] }
 0xedc   :  { %v1504_v19 = vpop.eup %1503 }
 0xedd   :  { %840 = vrot.lane.b32.xlu0 %v1504_v19, %s1600_s25 }
 0xede   :  { %v1506_v21 = vpop.eup %1505 }
 0xedf   :  { %v831_v8 = vadd.f32 1.0, %v1506_v21 }
 0xee1   :  { %1507 = vrcp.f32 %v831_v8 }
 0xeeb   :  { %v1508_v22 = vpop.eup %1507 }
 0xeec   :  { %v838_v25 = vmul.f32 %v1508_v22, %v836_v13 }
 0xf4f   :  { %v841_v23 = vpop.permute.xlu0 %840 }
 0xf50   :  { %v843_v24 = vmul.f32 %v1508_v22, %v841_v23 }
 0xf52   :  { %845 = vrot.lane.b32.xlu1 %v843_v24, %s1601_s4 }
 0xfc4   :  { %v846_v26 = vpop.permute.xlu1 %845 }
 0xfc5   :  { %v848_v27 = vadd.f32 %v846_v26, %v838_v25 }
 0xfc7   :  { %1509 = vtanh.f32 %v848_v27 }
 0xfd1   :  { %v1510_v28 = vpop.eup %1509 }
 0xfd2   :  { %851 = vrot.lane.b32.xlu0 %v1510_v28, %s1600_s25 }
0x1044   :  { %v852_v29 = vpop.permute.xlu0 %851 }
0x1045   :  { %v854_v30 = vmul.f32 %v1508_v22, %v852_v29 }
0x1047   :  { %v856_v31 = vrot.slane %v854_v30, 5  ;;  %v1073_v32 = vsel %vm128_vm5, %v1072_v12, %v854_v30  ;;  %v1079_v12 = vld [vmem:[%s1853_s5 + $0x18] sm:$0xff] }
0x1048   :  { %v1451_v14 = vpack.c.bf16 %v1079_v12, %v1078_v9 }
0x1049   :  { %857 = vrot.lane.b32.xlu1 %v856_v31, %s1601_s4 }
0x10bb   :  { %v858_v34 = vpop.permute.xlu1 %857 }
0x10bc   :  { %1369 = vmatmul.mubr.msk.f32.vlgmr.msra.gmra.mrb[6].mxu1 %vm145_vm8, %v858_v34 }
0x10bd   :  { %1390 = vmatprep.mubr.msk.f32.mxu1 %vm1598_vm0, %v1599_v11  ;;  %v943_v11 = vrot.slane %v848_v27, 7 }
0x118f   :  { %v927_v35 = vpop.f32.mrb[6].mxu1 }
0x1190   :  { %v932_v36 = vrot.slane %v927_v35, 2  ;;  %v1370_v37 = vpop.f32.mrb[7].mxu1 }
0x1192   :  { %v934_v38 = vadd.f32 %v932_v36, %v1725_v33 }
0x1194   :  { %1511 = vtanh.f32 %v934_v38  ;;  %v1228_v40 = vmul.f32 -1.442695, %v934_v38 }
0x1196   :  { %1513 = vpow2.f32 %v1228_v40 }
0x119e   :  { %v1512_v39 = vpop.eup %1511 }
0x119f   :  { %947 = vrot.lane.b32.xlu0 %v1512_v39, %s1600_s25 }
0x11a0   :  { %v1514_v41 = vpop.eup %1513 }
0x11a1   :  { %v938_v42 = vadd.f32 1.0, %v1514_v41 }
0x11a3   :  { %1515 = vrcp.f32 %v938_v42 }
0x11ad   :  { %v1516_v43 = vpop.eup %1515 }
0x11ae   :  { %v945_v46 = vmul.f32 %v1516_v43, %v943_v11 }
0x1211   :  { %v948_v44 = vpop.permute.xlu0 %947 }
0x1212   :  { %v950_v45 = vmul.f32 %v1516_v43, %v948_v44 }
0x1214   :  { %952 = vrot.lane.b32.xlu1 %v950_v45, %s1601_s4 }
0x1286   :  { %v953_v47 = vpop.permute.xlu1 %952 }
0x1287   :  { %v955_v48 = vadd.f32 %v953_v47, %v945_v46 }
0x1289   :  { %1517 = vtanh.f32 %v955_v48  ;;  %v1050_v2 = vrot.slane %v955_v48, 7 }
0x1293   :  { %v1518_v49 = vpop.eup %1517 }
0x1294   :  { %958 = vrot.lane.b32.xlu0 %v1518_v49, %s1600_s25 }
0x1306   :  { %v959_v50 = vpop.permute.xlu0 %958 }
0x1307   :  { %v961_v51 = vmul.f32 %v1516_v43, %v959_v50 }
0x1309   :  { %v963_v52 = vrot.slane %v961_v51, 6  ;;  %v1074_v53 = vsel %vm130_vm6, %v1073_v32, %v961_v51 }
0x130b   :  { %964 = vrot.lane.b32.xlu1 %v963_v52, %s1601_s4 }
0x137d   :  { %v965_v54 = vpop.permute.xlu1 %964 }
0x137e   :  { %1380 = vmatmul.mubr.msk.f32.vlgmr.msra.gmra.mrb[8].mxu0 %vm145_vm8, %v965_v54 }
0x1451   :  { %v1034_v55 = vpop.f32.mrb[8].mxu0 }
0x1452   :  { %v1039_v56 = vrot.slane %v1034_v55, 1  ;;  %v1381_v57 = vpop.f32.mrb[9].mxu0 }
0x1454   :  { %v1041_v58 = vadd.f32 %v1039_v56, %v1725_v33  ;;  %v1076_v33 = vld [vmem:[%s1853_s5] sm:$0xff]  ;;  %s1602_s5 = smov [#allocation7]  }
0x1455   :  { %v1448_v10 = vpack.c.bf16 %v1077_v7, %v1076_v33  ;;  %s1182_s6 = sshll.u32 %s1602_s5, 4  ;;  %s1183_s6 = int_to_ptr.vmem [resolvable:$true] %s1182_s6 }
0x1456   :  { %1519 = vtanh.f32 %v1041_v58  ;;  %v1230_v60 = vmul.f32 -1.442695, %v1041_v58  ;;  %s1565_s0 = scalar_lea.vmem %s1183_s6, 128  ;;  %p1570_p0 = scmp.lt.s32.totalorder %s1183_s6, %s1183_s6 }
0x1457   :  { %1449 = vmatpush3.bf16.msra.mxu1 %v1448_v10  ;;  %p1566_p13 = scmp.ne.s32.totalorder %s1183_s6, %s1565_s0  ;;  %p1571_p1 = scmp.lt.s32.totalorder %s1565_s0, %s1565_s0 }
0x1458   :  { %1521 = vpow2.f32 %v1230_v60  ;;  %1450 = vmatprep.subr.bf16.mxu1 %v1597_v3 }
0x1459   :  { %p1572_p2 = por %p1571_p1, %p1570_p0 }
0x145b   :  { %1452 = vmatpush3.bf16.msra.mxu1 %v1451_v14  ;;  %p1573_p3 = pnand %p1572_p2, %p1566_p13 }
0x1460   :  { %v1520_v59 = vpop.eup %1519 }
0x1461   :  { %1054 = vrot.lane.b32.xlu0 %v1520_v59, %s1600_s25 }
0x1462   :  { %v1522_v61 = vpop.eup %1521 }
0x1463   :  { %v1045_v62 = vadd.f32 1.0, %v1522_v61 }
0x1465   :  { %1523 = vrcp.f32 %v1045_v62 }
0x146f   :  { %v1524_v63 = vpop.eup %1523 }
0x1470   :  { %v1052_v4 = vmul.f32 %v1524_v63, %v1050_v2 }
0x14d3   :  { %v1055_v0 = vpop.permute.xlu0 %1054 }
0x14d4   :  { %v1057_v1 = vmul.f32 %v1524_v63, %v1055_v0 }
0x14d6   :  { %1059 = vrot.lane.b32.xlu1 %v1057_v1, %s1601_s4 }
0x1548   :  { %v1060_v5 = vpop.permute.xlu1 %1059 }
0x1549   :  { %v1062_v6 = vadd.f32 %v1060_v5, %v1052_v4 }
0x154b   :  { %1525 = vtanh.f32 %v1062_v6 }
0x1555   :  { %v1526_v15 = vpop.eup %1525 }
0x1556   :  { %1065 = vrot.lane.b32.xlu0 %v1526_v15, %s1600_s25 }
0x15c8   :  { %v1066_v16 = vpop.permute.xlu0 %1065 }
0x15c9   :  { %v1068_v17 = vmul.f32 %v1524_v63, %v1066_v16 }
0x15cb   :  { %v1075_v18 = vsel %vm132_vm7, %v1074_v53, %v1068_v17 }
0x15cc   :  { %1088 = vrot.lane.b32.xlu1 %v1075_v18, %s1601_s4 }
0x163e   :  { %v1089_v19 = vpop.permute.xlu1 %1088 }
0x163f   :  { %1391 = vmatmul.mubr.msk.f32.vlgmr.msra.gmra.mrb[8].mxu1 %vm145_vm8, %v1089_v19 }
0x1712   :  { %v1158_v21 = vpop.f32.mrb[8].mxu1 }
0x1713   :  { %v1159_v3 = vadd.f32 %v1231_v20, %v1158_v21  ;;  %v1392_v8 = vpop.f32.mrb[9].mxu1 }
0x1715   :  { %v1163_v22 = vsel %vm1162_vm9, %v1159_v3, -inf }
0x1716   :  { %1164 = vmax.xlane.f32.xlu0 %v1163_v22 }
0x17a3   :  { %v1165_v23 = vpop.xlane.xlu0 %1164 }
0x17a4   :  { %v1166_v24 = vsub.f32 %v1159_v3, %v1165_v23 }
0x17a6   :  { %v1167_v13 = vmul.f32 1.442695, %v1166_v24 }
0x17a8   :  { %1527 = vpow2.f32 %v1167_v13 }
0x17b2   :  { %v1528_v25 = vpop.eup %1527 }
0x17b3   :  { %v1169_v26 = vsel %vm1162_vm9, %v1528_v25, 0.0 }
0x17b4   :  { %1170 = vadd.xlane.f32.xlu1 %v1169_v26 }
0x1841   :  { %v1171_v27 = vpop.xlane.xlu1 %1170 }
0x1842   :  { %1529 = vlog2.f32 %v1171_v27 }
0x184c   :  { %v1530_v28 = vpop.eup %1529 }
0x184d   :  { %v1173_v29 = vmul.f32 0.6931472, %v1530_v28 }
0x184f   :  { %v1174_v30 = vsub.f32 %v1166_v24, %v1173_v29 }
0x1851   :  { %1175 = vst.msk [vmem:[#allocation7] sm:$0xff] %vm1162_vm9, %v1174_v30 }
0x1852   :  { %1576 = shalt.err (!%p1573_p3)
}
0x1853   :  { %s1577_s3 = scalar_lea.hbm %s1855_s7, 128 }
0x1854   :  { %p1578_p4 = scmp.ne.s32.totalorder %s1855_s7, %s1577_s3  ;;  %p1581_p5 = scmp.lt.u32.totalorder %s1577_s3, %s1855_s7 }
0x1856   :  { %p1583_p6 = pnand %p1581_p5, %p1578_p4 }
0x1858   :  { %1586 = shalt.err (!%p1583_p6)
}
0x1859   :  { %1185 = dma.vmem_to_hbm [thread:$0]  %s1183_s6, 128, %s1855_s7, [#allocation4]  }
0x185a   :  { %1591 = dma.done.wait [#allocation4], 128  }
0x185b   :  { %1592 = vsyncadd [#allocation4], 4294967168 }
0x185c   :  { %1189 = vsyncpa [#allocation3], 1 }
0x185d   :  { %1190 = vsyncpa [#allocation4], 1 }
0x185e   :  { %1191 = vsyncpa [#allocation5], 1 }

</bundles_post_ra>
